<compile_context>
chip_gen: v7x
topology: tpu7x:2x2x1
jax: 0.10.0
libtpu: 0.0.40
codegen_flags: <defaults>
</compile_context>

<pallas_src>
import functools

import jax
import jax.numpy as jnp
from jax.experimental import pallas as pl
from jax.experimental.pallas import tpu as pltpu

EPS = 1e-5  # nn.BatchNorm2d default eps

# VMEM budgets (bytes): sized so the double-buffered working set fits v7x's
# 32 MiB scoped VMEM; v5e/v6e (128 MiB physical) absorb it trivially.
_WEIGHT_PANEL_BUDGET = 8 << 20
_WORKING_SET_BUDGET = 24 << 20


def _round_up(x, m):
    return (x + m - 1) // m * m


def _pick_tile_n(k_pad, n_pad, esize, budget):
    """Largest 128-multiple dividing n_pad whose double-buffered (K, TILE_N)
    weight panel fits `budget`.  Prefers TILE_N == n_pad (weight fully
    resident -> the patch matrix is read from HBM exactly once per phase)."""
    t = n_pad
    while t > 128:
        if n_pad % t == 0 and 2 * k_pad * t * esize <= budget:
            return t
        t -= 128
    return 128


def _pick_tile_m(m, k_pad, tile_n, esize, budget):
    """Largest 16-aligned M tile whose double-buffered working set fits
    `budget`; prefers an exact divisor of M (no padded tail rows, no final
    slice copy on the M axis)."""
    fixed = 2 * k_pad * tile_n * esize + 64 * tile_n * 4
    per_row = 2 * (k_pad * esize + tile_n * 4)      # patches (2x) + f32 out (2x)
    cap = (budget - fixed) // per_row
    cap = int(max(16, min(1024, cap))) // 16 * 16
    cap = max(cap, 16)
    if m <= cap:
        return _round_up(m, 16)
    t = cap
    while t >= max(128, cap // 2):
        if m % t == 0:
            return t                                # M_pad == M
        t -= 16
    return cap                                      # pad M; tail masked in stats


def _make_stats_kernel(tile_m, m_per, m_rows, need_mask):
    """Phase 1: per-channel sum(y) and sum((y - mu)^2) with y = patches @ W.

    Accumulators are (8, TILE_N): the (1, TILE_N) cross-sublane reduce is
    broadcast-added into every row so the output block stays (8, 128)-aligned.
    The epilogue reads one row per M-split partial.
    """

    def kernel(p_ref, w_ref, mu_ref, sum_ref, sq_ref, acc_sum, acc_sq):
        i = pl.program_id(2)  # M accumulation axis (innermost, "arbitrary")

        @pl.when(i == 0)
        def _():
            acc_sum[...] = jnp.zeros_like(acc_sum)
            acc_sq[...] = jnp.zeros_like(acc_sq)

        # bf16 operands on the MXU, f32 accumulation.
        y = jnp.dot(p_ref[...], w_ref[...], preferred_element_type=jnp.float32)
        yc = y - mu_ref[...]
        if need_mask:
            # Zero-padded tail rows give y == 0 exactly (no bias), so sum(y) is
            # safe, but (0 - mu)^2 is not: mask them out of the centered term.
            row0 = (pl.program_id(0) * m_per + i) * tile_m
            rows = jax.lax.broadcasted_iota(jnp.int32, y.shape, 0) + row0
            yc = jnp.where(rows < m_rows, yc, 0.0)
        acc_sum[...] += jnp.sum(y, axis=0, keepdims=True)
        acc_sq[...] += jnp.sum(yc * yc, axis=0, keepdims=True)

        @pl.when(i == pl.num_programs(2) - 1)
        def _():
            sum_ref[...] = acc_sum[...]
            sq_ref[...] = acc_sq[...]

    return kernel


def _project_kernel(p_ref, w_ref, scale_ref, shift_ref, o_ref):
    """Phase 2: y = patches @ W, then the folded BN affine y*scale + shift."""
    y = jnp.dot(p_ref[...], w_ref[...], preferred_element_type=jnp.float32)
    o_ref[...] = (y * scale_ref[...] + shift_ref[...]).astype(o_ref.dtype)


def patch_embeddings(x, conv_w, conv_b, bn_gamma, bn_beta, *, patch_size,
                     matmul_dtype=jnp.bfloat16):
    """x: (B, C, H, W) NCHW float. Returns (B, num_patches, hidden) float32.

    matmul_dtype: explicit precision choice for the MXU operands (bf16 default
    = 2x MXU throughput and half the DMA bytes; jnp.float32 matches PyTorch's
    f32 Conv2d).  conv_b is accepted for API parity but unused: training-mode
    BatchNorm's mean subtraction cancels a per-channel bias exactly.
    """
    del conv_b  # exactly cancelled by training-mode BN mean subtraction
    B, C, H, W = x.shape
    P = patch_size
    Gh, Gw = H // P, W // P
    num_patches = Gh * Gw
    N = conv_w.shape[0]          # hidden_size
    K = C * P * P
    M = B * num_patches
    esize = jnp.dtype(matmul_dtype).itemsize

    # --- glue: patch extraction (kernel_size == stride -> pure relayout).
    # Cast BEFORE the transpose so the relayout moves half the bytes; jnp.pad
    # fuses the zero-pad into the same copy.
    # TODO(synk): fold the extraction into the kernel (NHWC view + (B,Gh,Gw)
    # grid reducing over patch rows) to drop this activation-sized HBM pass.
    x_mm = x.astype(matmul_dtype)
    patches = x_mm.reshape(B, C, Gh, P, Gw, P).transpose(0, 2, 4, 1, 3, 5)
    patches = patches.reshape(M, K)

    # --- lane/MXU friendly tiling.
    K_pad = _round_up(K, 128)
    N_pad = _round_up(N, 128)
    TILE_N = _pick_tile_n(K_pad, N_pad, esize, _WEIGHT_PANEL_BUDGET)
    n_tiles = N_pad // TILE_N
    TILE_M = _pick_tile_m(M, K_pad, TILE_N, esize, _WORKING_SET_BUDGET)
    M_pad = _round_up(M, TILE_M)
    m_tiles = M_pad // TILE_M
    n_split = 2 if (m_tiles >= 2 and m_tiles % 2 == 0) else 1  # v7x 2-TC split
    m_per = m_tiles // n_split

    patches_p = jnp.pad(patches, ((0, M_pad - M), (0, K_pad - K)))
    w_flat = conv_w.reshape(N, K).T                                   # (K, N)
    w_p = jnp.pad(w_flat.astype(matmul_dtype),
                  ((0, K_pad - K), (0, N_pad - N)))                   # (K_pad, N_pad)

    gamma_p = jnp.pad(bn_gamma.astype(jnp.float32), (0, N_pad - N))
    beta_p = jnp.pad(bn_beta.astype(jnp.float32), (0, N_pad - N))

    # Stable-mean shift: by linearity mean(y) == colsum(patches) @ W / M.
    col_sum = jnp.sum(patches_p, axis=0, keepdims=True, dtype=jnp.float32)
    mu_p = (col_sum @ w_p.astype(jnp.float32)) * jnp.float32(1.0 / M)  # (1, N_pad)

    vmem_limit = int(min(max(
        2 * TILE_M * K_pad * esize          # patches tile, double-buffered
        + 2 * K_pad * TILE_N * esize        # weight panel, double-buffered
        + 2 * TILE_M * TILE_N * 4           # f32 output tile, double-buffered
        + 64 * TILE_N * 4                   # stat/scale/shift rows + scratch
        + (2 << 20),                        # headroom
        16 << 20), 32 << 20))

    # ------------- phase 1: per-channel sum and centered sum-of-squares ------
    stats_kernel = _make_stats_kernel(TILE_M, m_per, M, need_mask=(M_pad != M))
    psum, psq = pl.pallas_call(
        stats_kernel,
        out_shape=(jax.ShapeDtypeStruct((8 * n_split, N_pad), jnp.float32),
                   jax.ShapeDtypeStruct((8 * n_split, N_pad), jnp.float32)),
        grid=(n_split, n_tiles, m_per),
        in_specs=[
            pl.BlockSpec((TILE_M, K_pad), lambda s, j, i: (s * m_per + i, 0)),
            pl.BlockSpec((K_pad, TILE_N), lambda s, j, i: (0, j)),
            pl.BlockSpec((1, TILE_N), lambda s, j, i: (0, j)),
        ],
        out_specs=(
            pl.BlockSpec((8, TILE_N), lambda s, j, i: (s, j)),
            pl.BlockSpec((8, TILE_N), lambda s, j, i: (s, j)),
        ),
        scratch_shapes=[pltpu.VMEM((8, TILE_N), jnp.float32),
                        pltpu.VMEM((8, TILE_N), jnp.float32)],
        compiler_params=pltpu.CompilerParams(
            dimension_semantics=("parallel", "parallel", "arbitrary"),
            vmem_limit_bytes=vmem_limit),
    )(patches_p, w_p, mu_p)

    # Fold training-mode BN into one per-channel FMA (shifted two-pass var).
    ch_sum = jnp.sum(psum[::8], axis=0)            # one row per M-split partial
    ch_sqc = jnp.sum(psq[::8], axis=0)
    inv_m = jnp.float32(1.0 / M)
    mean = ch_sum * inv_m
    var = jnp.maximum(ch_sqc * inv_m - jnp.square(mean - mu_p[0]), 0.0)
    inv_std = jax.lax.rsqrt(var + jnp.float32(EPS))
    scale = (gamma_p * inv_std).reshape(1, N_pad)
    shift = (beta_p - mean * gamma_p * inv_std).reshape(1, N_pad)

    # ------------- phase 2: projection + fused normalize ---------------------
    # M leading ("parallel" -> megacore shards M, not N); the patch tile's
    # block index is constant across inner N steps, so it is DMA'd once.
    out_pad = pl.pallas_call(
        _project_kernel,
        out_shape=jax.ShapeDtypeStruct((M_pad, N_pad), jnp.float32),
        grid=(m_tiles, n_tiles),
        in_specs=[
            pl.BlockSpec((TILE_M, K_pad), lambda i, j: (i, 0)),
            pl.BlockSpec((K_pad, TILE_N), lambda i, j: (0, j)),
            pl.BlockSpec((1, TILE_N), lambda i, j: (0, j)),
            pl.BlockSpec((1, TILE_N), lambda i, j: (0, j)),
        ],
        out_specs=pl.BlockSpec((TILE_M, TILE_N), lambda i, j: (i, j)),
        compiler_params=pltpu.CompilerParams(
            dimension_semantics=("parallel", "parallel"),
            vmem_limit_bytes=vmem_limit),
    )(patches_p, w_p, scale, shift)

    # Identity (no copy) when M_pad == M and N_pad == N (typical ViT sizes).
    return out_pad[:M, :N].reshape(B, num_patches, N)


def _reference(x, conv_w, conv_b, bn_gamma, bn_beta, patch_size,
               matmul_dtype=jnp.float32):
    """Pure-JAX reference of the PyTorch forward (training-mode BN).

    matmul_dtype=jnp.bfloat16 rounds the matmul operands like the kernel does.
    """
    B, C, H, W = x.shape
    P = patch_size
    Gh, Gw = H // P, W // P
    N = conv_w.shape[0]
    patches = x.reshape(B, C, Gh, P, Gw, P).transpose(0, 2, 4, 1, 3, 5)
    patches = patches.reshape(B * Gh * Gw, C * P * P)
    w = conv_w.reshape(N, -1).T
    y = jnp.dot(patches.astype(matmul_dtype).astype(jnp.float32),
                w.astype(matmul_dtype).astype(jnp.float32),
                preferred_element_type=jnp.float32) + conv_b[None, :]
    mean = jnp.mean(y, axis=0, keepdims=True)
    var = jnp.mean(jnp.square(y - mean), axis=0, keepdims=True)
    y = (y - mean) / jnp.sqrt(var + EPS) * bn_gamma[None, :] + bn_beta[None, :]
    return y.reshape(B, Gh * Gw, N)


if __name__ == "__main__":
    # Small demo: input_resolution=16, patch_size=4, hidden_size=32, in_channels=3
    B, C, H, P, HID = 2, 3, 16, 4, 32

    key = jax.random.PRNGKey(0)
    k_x, k_w, k_b = jax.random.split(key, 3)
    x = jax.random.normal(k_x, (B, C, H, H), dtype=jnp.float32)
    conv_w = jax.random.normal(k_w, (HID, C, P, P), dtype=jnp.float32) * 0.05
    conv_b = jax.random.normal(k_b, (HID,), dtype=jnp.float32) * 0.01
    bn_gamma = jnp.ones((HID,), dtype=jnp.float32)   # BatchNorm2d default init
    bn_beta = jnp.zeros((HID,), dtype=jnp.float32)

    fn = jax.jit(functools.partial(patch_embeddings, patch_size=P))
    out = fn(x, conv_w, conv_b, bn_gamma, bn_beta)
    jax.block_until_ready(out)

    num_patches = (H // P) * (H // P)
    assert out.shape == (B, num_patches, HID), out.shape

    # Tight check: reference using the same bf16-rounded MXU operands.
    ref_bf16 = _reference(x, conv_w, conv_b, bn_gamma, bn_beta, P, jnp.bfloat16)
    assert jnp.allclose(out, ref_bf16, atol=2e-3, rtol=2e-3), "mismatch vs bf16 ref"

    # Loose check vs full-f32 PyTorch-faithful math (gap = bf16 operand rounding).
    ref_f32 = _reference(x, conv_w, conv_b, bn_gamma, bn_beta, P, jnp.float32)
    assert jnp.allclose(out, ref_f32, atol=5e-2, rtol=5e-2), "mismatch vs f32 ref"

    print("KERNEL_OK")
</pallas_src>

<mosaic_0001>
module attributes {stable_mosaic.version = 11 : i64} {
  func.func @kernel(%arg0: i32, %arg1: i32, %arg2: i32, %arg3: memref<32x128xbf16, #tpu.memory_space<vmem>>, %arg4: memref<128x128xbf16, #tpu.memory_space<vmem>>, %arg5: memref<1x128xf32, #tpu.memory_space<vmem>>, %arg6: memref<8x128xf32, #tpu.memory_space<vmem>>, %arg7: memref<8x128xf32, #tpu.memory_space<vmem>>, %arg8: memref<8x128xf32, #tpu.memory_space<vmem>>, %arg9: memref<8x128xf32, #tpu.memory_space<vmem>>) attributes {dimension_semantics = [#tpu.dimension_semantics<parallel>, #tpu.dimension_semantics<parallel>, #tpu.dimension_semantics<arbitrary>], iteration_bounds = array<i64: 1, 1, 1>, scalar_prefetch = 0 : i64, scratch_operands = 2 : i64, tpu.core_type = #tpu.core_type<tc>, window_params = [{transform_indices = @transform_0, window_bounds = array<i64: 32, 128>}, {transform_indices = @transform_1, window_bounds = array<i64: 128, 128>}, {transform_indices = @transform_2, window_bounds = array<i64: 1, 128>}, {transform_indices = @transform_3, window_bounds = array<i64: 8, 128>}, {transform_indices = @transform_4, window_bounds = array<i64: 8, 128>}]} {
    %c0_i32 = arith.constant 0 : i32
    %0 = arith.cmpi eq, %arg2, %c0_i32 : i32
    %1 = arith.extui %0 : i1 to i32
    %c0_i32_0 = arith.constant 0 : i32
    %2 = arith.cmpi ne, %1, %c0_i32_0 : i32
    scf.if %2 {
      %cst_18 = arith.constant 0.000000e+00 : f32
      %25 = vector.broadcast %cst_18 : f32 to vector<8x128xf32>
      %c0_19 = arith.constant 0 : index
      %c0_20 = arith.constant 0 : index
      %26 = vector.load %arg8[%c0_19, %c0_20] : memref<8x128xf32, #tpu.memory_space<vmem>>, vector<8x128xf32>
      tpu.vector_store %arg8[%c0_19, %c0_20], %25 {strides = array<i32>} : memref<8x128xf32, #tpu.memory_space<vmem>>, vector<8x128xf32>,
      %cst_21 = arith.constant 0.000000e+00 : f32
      %27 = vector.broadcast %cst_21 : f32 to vector<8x128xf32>
      %c0_22 = arith.constant 0 : index
      %c0_23 = arith.constant 0 : index
      %28 = vector.load %arg9[%c0_22, %c0_23] : memref<8x128xf32, #tpu.memory_space<vmem>>, vector<8x128xf32>
      tpu.vector_store %arg9[%c0_22, %c0_23], %27 {strides = array<i32>} : memref<8x128xf32, #tpu.memory_space<vmem>>, vector<8x128xf32>,
    } else {
    }
    %c0 = arith.constant 0 : index
    %c0_1 = arith.constant 0 : index
    %3 = vector.load %arg3[%c0, %c0_1] : memref<32x128xbf16, #tpu.memory_space<vmem>>, vector<32x128xbf16>
    %c0_2 = arith.constant 0 : index
    %c0_3 = arith.constant 0 : index
    %4 = vector.load %arg4[%c0_2, %c0_3] : memref<128x128xbf16, #tpu.memory_space<vmem>>, vector<128x128xbf16>
    %cst = arith.constant dense<0.000000e+00> : vector<32x128xf32>
    %5 = tpu.matmul %3, %4, %cst {dimension_numbers = #tpu.dot_dimension_numbers<[1], [0], [0], [1], [0, 0, 1, 1], [], []>} : vector<32x128xbf16>, vector<128x128xbf16>, vector<32x128xf32> -> vector<32x128xf32>
    %c0_4 = arith.constant 0 : index
    %c0_5 = arith.constant 0 : index
    %6 = vector.load %arg5[%c0_4, %c0_5] : memref<1x128xf32, #tpu.memory_space<vmem>>, vector<1x128xf32>
    %7 = vector.broadcast %6 : vector<1x128xf32> to vector<32x128xf32>
    %8 = arith.subf %5, %7 : vector<32x128xf32>
    %c0_6 = arith.constant 0 : index
    %c0_7 = arith.constant 0 : index
    %9 = vector.load %arg8[%c0_6, %c0_7] : memref<8x128xf32, #tpu.memory_space<vmem>>, vector<8x128xf32>
    %cst_8 = arith.constant dense<0.000000e+00> : vector<128xf32>
    %10 = vector.multi_reduction <add>, %5, %cst_8 [0] : vector<32x128xf32> to vector<128xf32>
    %11 = vector.shape_cast %10 : vector<128xf32> to vector<1x128xf32>
    %12 = vector.broadcast %11 : vector<1x128xf32> to vector<8x128xf32>
    %13 = arith.addf %9, %12 : vector<8x128xf32>
    %c0_9 = arith.constant 0 : index
    %c0_10 = arith.constant 0 : index
    %14 = vector.load %arg8[%c0_9, %c0_10] : memref<8x128xf32, #tpu.memory_space<vmem>>, vector<8x128xf32>
    tpu.vector_store %arg8[%c0_9, %c0_10], %13 {strides = array<i32>} : memref<8x128xf32, #tpu.memory_space<vmem>>, vector<8x128xf32>,
    %c0_11 = arith.constant 0 : index
    %c0_12 = arith.constant 0 : index
    %15 = vector.load %arg9[%c0_11, %c0_12] : memref<8x128xf32, #tpu.memory_space<vmem>>, vector<8x128xf32>
    %16 = arith.mulf %8, %8 : vector<32x128xf32>
    %cst_13 = arith.constant dense<0.000000e+00> : vector<128xf32>
    %17 = vector.multi_reduction <add>, %16, %cst_13 [0] : vector<32x128xf32> to vector<128xf32>
    %18 = vector.shape_cast %17 : vector<128xf32> to vector<1x128xf32>
    %19 = vector.broadcast %18 : vector<1x128xf32> to vector<8x128xf32>
    %20 = arith.addf %15, %19 : vector<8x128xf32>
    %c0_14 = arith.constant 0 : index
    %c0_15 = arith.constant 0 : index
    %21 = vector.load %arg9[%c0_14, %c0_15] : memref<8x128xf32, #tpu.memory_space<vmem>>, vector<8x128xf32>
    tpu.vector_store %arg9[%c0_14, %c0_15], %20 {strides = array<i32>} : memref<8x128xf32, #tpu.memory_space<vmem>>, vector<8x128xf32>,
    %c0_i32_16 = arith.constant 0 : i32
    %22 = arith.cmpi eq, %arg2, %c0_i32_16 : i32
    %23 = arith.extui %22 : i1 to i32
    %c0_i32_17 = arith.constant 0 : i32
    %24 = arith.cmpi ne, %23, %c0_i32_17 : i32
    scf.if %24 {
      %c0_18 = arith.constant 0 : index
      %c0_19 = arith.constant 0 : index
      %25 = vector.load %arg8[%c0_18, %c0_19] : memref<8x128xf32, #tpu.memory_space<vmem>>, vector<8x128xf32>
      %c0_20 = arith.constant 0 : index
      %c0_21 = arith.constant 0 : index
      %26 = vector.load %arg6[%c0_20, %c0_21] : memref<8x128xf32, #tpu.memory_space<vmem>>, vector<8x128xf32>
      tpu.vector_store %arg6[%c0_20, %c0_21], %25 {strides = array<i32>} : memref<8x128xf32, #tpu.memory_space<vmem>>, vector<8x128xf32>,
      %c0_22 = arith.constant 0 : index
      %c0_23 = arith.constant 0 : index
      %27 = vector.load %arg9[%c0_22, %c0_23] : memref<8x128xf32, #tpu.memory_space<vmem>>, vector<8x128xf32>
      %c0_24 = arith.constant 0 : index
      %c0_25 = arith.constant 0 : index
      %28 = vector.load %arg7[%c0_24, %c0_25] : memref<8x128xf32, #tpu.memory_space<vmem>>, vector<8x128xf32>
      tpu.vector_store %arg7[%c0_24, %c0_25], %27 {strides = array<i32>} : memref<8x128xf32, #tpu.memory_space<vmem>>, vector<8x128xf32>,
    } else {
    }
    return
  }
  func.func @transform_0(%arg0: i32, %arg1: i32, %arg2: i32) -> (i32, i32) {
    %c1_i32 = arith.constant 1 : i32
    %0 = arith.muli %arg0, %c1_i32 : i32
    %1 = arith.addi %0, %arg2 : i32
    %c0_i32 = arith.constant 0 : i32
    %c0_i32_0 = arith.constant 0 : i32
    return %1, %c0_i32 : i32, i32
  }
  func.func @transform_1(%arg0: i32, %arg1: i32, %arg2: i32) -> (i32, i32) {
    %c0_i32 = arith.constant 0 : i32
    %c0_i32_0 = arith.constant 0 : i32
    return %c0_i32, %arg1 : i32, i32
  }
  func.func @transform_2(%arg0: i32, %arg1: i32, %arg2: i32) -> (i32, i32) {
    %c0_i32 = arith.constant 0 : i32
    %c0_i32_0 = arith.constant 0 : i32
    return %c0_i32, %arg1 : i32, i32
  }
  func.func @transform_3(%arg0: i32, %arg1: i32, %arg2: i32) -> (i32, i32) {
    %c0_i32 = arith.constant 0 : i32
    return %arg0, %arg1 : i32, i32
  }
  func.func @transform_4(%arg0: i32, %arg1: i32, %arg2: i32) -> (i32, i32) {
    %c0_i32 = arith.constant 0 : i32
    return %arg0, %arg1 : i32, i32
  }
}

module attributes {stable_mosaic.version = 11 : i64} {
  func.func @_project_kernel(%arg0: i32, %arg1: i32, %arg2: memref<32x128xbf16, #tpu.memory_space<vmem>>, %arg3: memref<128x128xbf16, #tpu.memory_space<vmem>>, %arg4: memref<1x128xf32, #tpu.memory_space<vmem>>, %arg5: memref<1x128xf32, #tpu.memory_space<vmem>>, %arg6: memref<32x128xf32, #tpu.memory_space<vmem>>) attributes {dimension_semantics = [#tpu.dimension_semantics<parallel>, #tpu.dimension_semantics<parallel>], iteration_bounds = array<i64: 1, 1>, scalar_prefetch = 0 : i64, scratch_operands = 0 : i64, tpu.core_type = #tpu.core_type<tc>, window_params = [{transform_indices = @transform_0, window_bounds = array<i64: 32, 128>}, {transform_indices = @transform_1, window_bounds = array<i64: 128, 128>}, {transform_indices = @transform_2, window_bounds = array<i64: 1, 128>}, {transform_indices = @transform_3, window_bounds = array<i64: 1, 128>}, {transform_indices = @transform_4, window_bounds = array<i64: 32, 128>}]} {
    %c0 = arith.constant 0 : index
    %c0_0 = arith.constant 0 : index
    %0 = vector.load %arg2[%c0, %c0_0] : memref<32x128xbf16, #tpu.memory_space<vmem>>, vector<32x128xbf16>
    %c0_1 = arith.constant 0 : index
    %c0_2 = arith.constant 0 : index
    %1 = vector.load %arg3[%c0_1, %c0_2] : memref<128x128xbf16, #tpu.memory_space<vmem>>, vector<128x128xbf16>
    %cst = arith.constant dense<0.000000e+00> : vector<32x128xf32>
    %2 = tpu.matmul %0, %1, %cst {dimension_numbers = #tpu.dot_dimension_numbers<[1], [0], [0], [1], [0, 0, 1, 1], [], []>} : vector<32x128xbf16>, vector<128x128xbf16>, vector<32x128xf32> -> vector<32x128xf32>
    %c0_3 = arith.constant 0 : index
    %c0_4 = arith.constant 0 : index
    %3 = vector.load %arg4[%c0_3, %c0_4] : memref<1x128xf32, #tpu.memory_space<vmem>>, vector<1x128xf32>
    %4 = vector.broadcast %3 : vector<1x128xf32> to vector<32x128xf32>
    %5 = arith.mulf %2, %4 : vector<32x128xf32>
    %c0_5 = arith.constant 0 : index
    %c0_6 = arith.constant 0 : index
    %6 = vector.load %arg5[%c0_5, %c0_6] : memref<1x128xf32, #tpu.memory_space<vmem>>, vector<1x128xf32>
    %7 = vector.broadcast %6 : vector<1x128xf32> to vector<32x128xf32>
    %8 = arith.addf %5, %7 : vector<32x128xf32>
    %c0_7 = arith.constant 0 : index
    %c0_8 = arith.constant 0 : index
    %9 = vector.load %arg6[%c0_7, %c0_8] : memref<32x128xf32, #tpu.memory_space<vmem>>, vector<32x128xf32>
    tpu.vector_store %arg6[%c0_7, %c0_8], %8 {strides = array<i32>} : memref<32x128xf32, #tpu.memory_space<vmem>>, vector<32x128xf32>,
    return
  }
  func.func @transform_0(%arg0: i32, %arg1: i32) -> (i32, i32) {
    %c0_i32 = arith.constant 0 : i32
    %c0_i32_0 = arith.constant 0 : i32
    return %arg0, %c0_i32 : i32, i32
  }
  func.func @transform_1(%arg0: i32, %arg1: i32) -> (i32, i32) {
    %c0_i32 = arith.constant 0 : i32
    %c0_i32_0 = arith.constant 0 : i32
    return %c0_i32, %arg1 : i32, i32
  }
  func.func @transform_2(%arg0: i32, %arg1: i32) -> (i32, i32) {
    %c0_i32 = arith.constant 0 : i32
    %c0_i32_0 = arith.constant 0 : i32
    return %c0_i32, %arg1 : i32, i32
  }
  func.func @transform_3(%arg0: i32, %arg1: i32) -> (i32, i32) {
    %c0_i32 = arith.constant 0 : i32
    %c0_i32_0 = arith.constant 0 : i32
    return %c0_i32, %arg1 : i32, i32
  }
  func.func @transform_4(%arg0: i32, %arg1: i32) -> (i32, i32) {
    %c0_i32 = arith.constant 0 : i32
    return %arg0, %arg1 : i32, i32
  }
}

</mosaic_0001>

<bundles_post_ra>
// kernel: patch_embeddings.2
= control target key start
LH: loop header
LB: loop body
LE: loop exit
PB: predicated region body
PF: predicated region fallthrough
CT: control target
= control target key end

     0   :  { %s349_s1 = inlined_call_operand.vmem [shape: bf16[128,128], index: 1, kind: input, shape index: {}]   ;;  %s350_s0 = inlined_call_operand.vmem [shape: bf16[32,128], index: 0, kind: input, shape index: {}]   ;;  %s351_s2 = inlined_call_operand.vmem [shape: f32[1,128], index: 2, kind: input, shape index: {}]   ;;  %s352_s3 = inlined_call_operand.vmem [shape: f32[8,128], index: 3, kind: output, shape index: {0}]   ;;  %s353_s4 = inlined_call_operand.vmem [shape: f32[8,128], index: 4, kind: output, shape index: {1}]  }
   0x1   :  { %v275_v0 = vld [vmem:[%s349_s1] sm:$0xff]   ;;  %v276_v1 = vld [vmem:[%s349_s1 + $0x8] sm:$0xff]   ;;  %v277_v2 = vld [vmem:[%s349_s1 + $0x10] sm:$0xff]  }
   0x2   :  { %255 = vmatprep.subr.bf16.mxu0 %v275_v0  ;;  %v278_v3 = vld [vmem:[%s349_s1 + $0x18] sm:$0xff]   ;;  %v283_v4 = vld [vmem:[%s350_s0] sm:$0xff]   ;;  %v280_v6 = vld [vmem:[%s349_s1 + $0x28] sm:$0xff]  }
   0x3   :  { %256 = vmatpush3.bf16.msra.mxu0 %v275_v0  ;;  %271 = vmatprep.mubr.bf16.mxu0 %v283_v4  ;;  %v279_v5 = vld [vmem:[%s349_s1 + $0x20] sm:$0xff]   ;;  %v281_v7 = vld [vmem:[%s349_s1 + $0x30] sm:$0xff]   ;;  %v282_v8 = vld [vmem:[%s349_s1 + $0x38] sm:$0xff]  }
   0x4   :  { %257 = vmatprep.subr.bf16.mxu0 %v276_v1  ;;  %v284_v9 = vld [vmem:[%s350_s0 + $0x8] sm:$0xff]   ;;  %v244_v10 = vld [vmem:[%s351_s2] ss:$0 sm:$0xff] }
   0x7   :  { %258 = vmatpush3.bf16.msra.mxu0 %v276_v1 }
   0x8   :  { %259 = vmatprep.subr.bf16.mxu0 %v277_v2 }
   0xb   :  { %260 = vmatpush3.bf16.msra.mxu0 %v277_v2 }
   0xc   :  { %261 = vmatprep.subr.bf16.mxu0 %v278_v3 }
   0xf   :  { %262 = vmatpush3.bf16.msra.mxu0 %v278_v3 }
  0x10   :  { %263 = vmatprep.subr.bf16.mxu0 %v279_v5 }
  0x13   :  { %264 = vmatpush3.bf16.msra.mxu0 %v279_v5 }
  0x14   :  { %265 = vmatprep.subr.bf16.mxu0 %v280_v6 }
  0x17   :  { %266 = vmatpush3.bf16.msra.mxu0 %v280_v6 }
  0x18   :  { %267 = vmatprep.subr.bf16.mxu0 %v281_v7 }
  0x1b   :  { %268 = vmatpush3.bf16.msra.mxu0 %v281_v7 }
  0x1c   :  { %269 = vmatprep.subr.bf16.mxu0 %v282_v8 }
  0x1f   :  { %270 = vmatpush3.bf16.msra.mxu0 %v282_v8 }
  0x22   :  { %272 = vmatmul.mubr.bf16.vlgmr.msra.gmra.mrb[0].mxu0 %v284_v9 }
  0xf5   :  { %v273_v11 = vpop.f32.mrb[0].mxu0 }
  0xf6   :  { %v159_v12 = vpop.f32.mrb[1].mxu0  ;;  %v183_v16 = vsub.f32 %v273_v11, %v244_v10 }
  0xf7   :  { %v181_v13 = vsub.f32 %v159_v12, %v244_v10  ;;  %v274_v14 = vpop.f32.mrb[2].mxu0 }
  0xf8   :  { %v162_v15 = vpop.f32.mrb[3].mxu0  ;;  %v184_v20 = vsub.f32 %v274_v14, %v244_v10  ;;  %v200_v23 = vmul.f32 %v183_v16, %v183_v16 }
  0xf9   :  { %v182_v17 = vsub.f32 %v162_v15, %v244_v10  ;;  %v186_v18 = vadd.f32 %v162_v15, %v159_v12  ;;  %v198_v19 = vmul.f32 %v181_v13, %v181_v13 }
  0xfa   :  { %v201_v26 = vmul.f32 %v184_v20, %v184_v20 }
  0xfb   :  { %v187_v21 = vadd.f32 %v273_v11, %v186_v18  ;;  %v199_v22 = vmul.f32 %v182_v17, %v182_v17 }
  0xfd   :  { %v188_v24 = vadd.f32 %v274_v14, %v187_v21  ;;  %v202_v25 = vadd.f32 %v199_v22, %v198_v19 }
  0xff   :  { %v189_v27 = vrot.slane %v188_v24, 4  ;;  %v203_v28 = vadd.f32 %v202_v25, %v200_v23 }
 0x101   :  { %v190_v29 = vadd.f32 %v189_v27, %v188_v24  ;;  %v204_v30 = vadd.f32 %v203_v28, %v201_v26 }
 0x103   :  { %v191_v31 = vrot.slane %v190_v29, 2  ;;  %v205_v32 = vrot.slane %v204_v30, 4 }
 0x105   :  { %v192_v33 = vadd.f32 %v191_v31, %v190_v29  ;;  %v206_v34 = vadd.f32 %v205_v32, %v204_v30 }
 0x107   :  { %v193_v35 = vrot.slane %v192_v33, 1  ;;  %v207_v36 = vrot.slane %v206_v34, 2 }
 0x109   :  { %v194_v37 = vadd.f32 %v193_v35, %v192_v33  ;;  %v208_v38 = vadd.f32 %v207_v36, %v206_v34 }
 0x10b   :  { %v209_v39 = vrot.slane %v208_v38, 1  ;;  %217 = vst [vmem:[%s352_s3] sm:$0xff] %v194_v37 }
 0x10d   :  { %v210_v40 = vadd.f32 %v209_v39, %v208_v38 }
 0x10f   :  { %219 = vst [vmem:[%s353_s4] sm:$0xff] %v210_v40 }

// kernel: patch_embeddings.3
= control target key start
LH: loop header
LB: loop body
LE: loop exit
PB: predicated region body
PF: predicated region fallthrough
CT: control target
= control target key end

     0   :  { %s345_s0 = inlined_call_operand.vmem [shape: bf16[32,128], index: 0, kind: input, shape index: {}]   ;;  %s346_s1 = inlined_call_operand.vmem [shape: bf16[128,128], index: 1, kind: input, shape index: {}]   ;;  %s347_s2 = inlined_call_operand.vmem [shape: f32[1,128], index: 2, kind: input, shape index: {}]   ;;  %s348_s3 = inlined_call_operand.vmem [shape: f32[1,128], index: 3, kind: input, shape index: {}]   ;;  %s349_s4 = inlined_call_operand.hbm [shape: f32[32,128], index: 4, kind: output, shape index: {}]  }
   0x1   :  { %v235_v0 = vld [vmem:[%s346_s1] sm:$0xff]   ;;  %v236_v1 = vld [vmem:[%s346_s1 + $0x8] sm:$0xff]   ;;  %v237_v2 = vld [vmem:[%s346_s1 + $0x10] sm:$0xff]  }
   0x2   :  { %212 = vmatprep.subr.bf16.mxu0 %v235_v0  ;;  %v238_v3 = vld [vmem:[%s346_s1 + $0x18] sm:$0xff]   ;;  %v243_v4 = vld [vmem:[%s345_s0] sm:$0xff]  }
   0x3   :  { %213 = vmatpush3.bf16.msra.mxu0 %v235_v0  ;;  %228 = vmatprep.mubr.bf16.mxu0 %v243_v4 }
   0x4   :  { %214 = vmatprep.subr.bf16.mxu0 %v236_v1 }
   0x7   :  { %215 = vmatpush3.bf16.msra.mxu0 %v236_v1 }
   0x8   :  { %216 = vmatprep.subr.bf16.mxu0 %v237_v2 }
   0x9   :  { %9 = vsyncpa [#allocation3], 0  ;;  %v239_v5 = vld [vmem:[%s346_s1 + $0x20] sm:$0xff]   ;;  %v240_v6 = vld [vmem:[%s346_s1 + $0x28] sm:$0xff]  }
   0xa   :  { %v241_v7 = vld [vmem:[%s346_s1 + $0x30] sm:$0xff]   ;;  %v242_v8 = vld [vmem:[%s346_s1 + $0x38] sm:$0xff]   ;;  %v244_v9 = vld [vmem:[%s345_s0 + $0x8] sm:$0xff]   ;;  %s269_s1 = smov [#allocation2]  }
   0xb   :  { %217 = vmatpush3.bf16.msra.mxu0 %v237_v2  ;;  %v200_v10 = vld [vmem:[%s347_s2] ss:$0 sm:$0xff]  ;;  %s179_s13 = sshll.u32 %s269_s1, 4  ;;  %s180_s13 = int_to_ptr.vmem [resolvable:$true] %s179_s13 }
   0xc   :  { %218 = vmatprep.subr.bf16.mxu0 %v238_v3  ;;  %v201_v12 = vld [vmem:[%s348_s3] ss:$0 sm:$0xff]  ;;  %s245_s0 = scalar_lea.vmem %s180_s13, 512  ;;  %p250_p1 = scmp.lt.s32.totalorder %s180_s13, %s180_s13 }
   0xd   :  { %p246_p0 = scmp.ne.s32.totalorder %s180_s13, %s245_s0  ;;  %p251_p2 = scmp.lt.s32.totalorder %s245_s0, %s245_s0 }
   0xf   :  { %219 = vmatpush3.bf16.msra.mxu0 %v238_v3  ;;  %p252_p3 = por %p251_p2, %p250_p1 }
  0x10   :  { %220 = vmatprep.subr.bf16.mxu0 %v239_v5 }
  0x11   :  { %p253_p4 = pnand %p252_p3, %p246_p0 }
  0x13   :  { %221 = vmatpush3.bf16.msra.mxu0 %v239_v5 }
  0x14   :  { %222 = vmatprep.subr.bf16.mxu0 %v240_v6 }
  0x17   :  { %223 = vmatpush3.bf16.msra.mxu0 %v240_v6 }
  0x18   :  { %224 = vmatprep.subr.bf16.mxu0 %v241_v7 }
  0x1b   :  { %225 = vmatpush3.bf16.msra.mxu0 %v241_v7 }
  0x1c   :  { %226 = vmatprep.subr.bf16.mxu0 %v242_v8 }
  0x1f   :  { %227 = vmatpush3.bf16.msra.mxu0 %v242_v8 }
  0x22   :  { %229 = vmatmul.mubr.bf16.vlgmr.msra.gmra.mrb[0].mxu0 %v244_v9 }
  0xf5   :  { %v230_v11 = vpop.f32.mrb[0].mxu0 }
  0xf6   :  { %v157_v13 = vmul.f32 %v230_v11, %v200_v10  ;;  %v133_v14 = vpop.f32.mrb[1].mxu0 }
  0xf7   :  { %v155_v15 = vmul.f32 %v200_v10, %v133_v14  ;;  %v231_v16 = vpop.f32.mrb[2].mxu0 }
  0xf8   :  { %v168_v17 = vadd.f32 %v201_v12, %v157_v13  ;;  %v158_v18 = vmul.f32 %v231_v16, %v200_v10  ;;  %v136_v19 = vpop.f32.mrb[3].mxu0 }
  0xf9   :  { %v166_v20 = vadd.f32 %v201_v12, %v155_v15  ;;  %v156_v21 = vmul.f32 %v200_v10, %v136_v19 }
  0xfa   :  { %172 = vst [vmem:[#allocation2 + $0x10] sm:$0xff] %v168_v17  ;;  %v169_v22 = vadd.f32 %v201_v12, %v158_v18 }
  0xfb   :  { %170 = vst [vmem:[#allocation2] sm:$0xff] %v166_v20  ;;  %v167_v23 = vadd.f32 %v201_v12, %v156_v21 }
  0xfc   :  { %173 = vst [vmem:[#allocation2 + $0x18] sm:$0xff] %v169_v22 }
  0xfd   :  { %171 = vst [vmem:[#allocation2 + $0x8] sm:$0xff] %v167_v23 }
  0xfe   :  { %256 = shalt.err (!%p253_p4)
}
  0xff   :  { %s257_s14 = scalar_lea.hbm %s349_s4, 512 }
 0x100   :  { %p258_p5 = scmp.ne.s32.totalorder %s349_s4, %s257_s14  ;;  %p261_p6 = scmp.lt.u32.totalorder %s257_s14, %s349_s4 }
 0x102   :  { %p263_p7 = pnand %p261_p6, %p258_p5 }
 0x104   :  { %266 = shalt.err (!%p263_p7)
}
 0x105   :  { %s270_s19 = smov 128   ;;  %s271_s20 = smov 8  }
 0x106   :  { %185 = dma.vmem_to_hbm [thread:$0]  %s180_s13, 512, %s349_s4, [#allocation3], %s270_s19, %s270_s19, %s271_s20  }
 0x107   :  { %267 = dma.done.wait [#allocation3], 512  }
 0x108   :  { %268 = vsyncadd [#allocation3], 4294966784 }
 0x109   :  { %189 = vsyncpa [#allocation3], 1 }

</bundles_post_ra>
